<compile_context>
chip_gen: v7x
topology: tpu7x:2x2x1
jax: 0.10.0
libtpu: 0.0.40
codegen_flags: <defaults>
</compile_context>

<pallas_src>
import functools

import jax
import jax.numpy as jnp
import numpy as np
from jax.experimental import pallas as pl
from jax.experimental.pallas import tpu as pltpu

PAD = 3          # max padding needed (dilation-3 branch)
KSIZE = 3        # kernel_size of the module
BN_EPS = 1e-5
GUARD = 3        # extra flat-axis guard so every static shifted slice is in bounds

# The 13 distinct (dh, dw) taps used by the six dilated 1-D convs.
SHIFTS = tuple([(dh, 0) for dh in (-3, -2, -1, 0, 1, 2, 3)] +
               [(0, dw) for dw in (-3, -2, -1, 1, 2, 3)])
SHIFT_IDX = {s: i for i, s in enumerate(SHIFTS)}
NSHIFT = len(SHIFTS)


# ---------------------------------------------------------------------------
# Pass 1: fused conv taps (one matmul) + per-batch partial BN statistics.
# ---------------------------------------------------------------------------
def conv_kernel(x_ref, w_ref, b_ref, m_ref, feat_ref, stats_ref, *,
                shift_starts, L):
    # x_ref:     (1, Cin, Lp)  flattened zero-padded image for this batch elem
    # w_ref:     (Cout, NSHIFT*Cin) fused block-sparse tap weights
    # b_ref:     (Cout, 1)     fused conv biases
    # m_ref:     (1, L)        1.0 at valid (un-padded) columns, else 0.0
    # feat_ref:  (1, Cout, L)  masked conv feature (pre-BN)
    # stats_ref: (1, Cout, 2)  per-batch [sum, sum of squares] over valid cols
    pieces = [x_ref[0, :, s0:s0 + L] for s0 in shift_starts]   # 13 x (Cin, L)
    xim = jnp.concatenate(pieces, axis=0)                      # (NSHIFT*Cin, L)
    y = jnp.dot(w_ref[...], xim,
                preferred_element_type=jnp.float32) + b_ref[...]   # (Cout, L)
    ym = y * m_ref[...]                                        # zero pad columns
    feat_ref[0] = ym
    ssum = jnp.sum(ym, axis=1, keepdims=True)                  # (Cout, 1)
    ssq = jnp.sum(ym * ym, axis=1, keepdims=True)              # (Cout, 1)
    stats_ref[0] = jnp.concatenate([ssum, ssq], axis=1)        # (Cout, 2)


# ---------------------------------------------------------------------------
# Pass 2: reduce partial stats, BatchNorm (training-mode) + ReLU, streaming.
# ---------------------------------------------------------------------------
def bn_relu_kernel(feat_ref, stats_ref, g_ref, bt_ref, o_ref, *, inv_count):
    tot = jnp.sum(stats_ref[...], axis=0)                  # (Cout, 2)
    mean = tot[:, 0:1] * inv_count                         # (Cout, 1)
    var = tot[:, 1:2] * inv_count - mean * mean
    inv = jax.lax.rsqrt(var + jnp.float32(BN_EPS))
    scale = g_ref[...] * inv
    shift = bt_ref[...] - mean * scale
    o_ref[0] = jnp.maximum(feat_ref[0] * scale + shift, 0.0)


# ---------------------------------------------------------------------------
# Wrapper (layout plumbing only: pad / flatten / weight re-pack / un-pad).
# ---------------------------------------------------------------------------
def _build_fused_weight(params, Cin, Cout):
    """Pack the six OIHW conv weights into one (Cout, 13*Cin) block-sparse matrix."""
    wf = jnp.zeros((Cout, NSHIFT * Cin), jnp.float32)
    branches = [(params["w_first"], 1, True), (params["w_second"], 2, True),
                (params["w_third"], 3, True), (params["w_first2"], 1, False),
                (params["w_second2"], 2, False), (params["w_third2"], 3, False)]
    co = 0
    for w, dil, vertical in branches:
        c = w.shape[0]
        for t in range(KSIZE):
            if vertical:                       # kernel (3,1): taps along H
                s = SHIFT_IDX[((t - 1) * dil, 0)]
                wt = w[:, :, t, 0]             # (c, Cin)
            else:                              # kernel (1,3): taps along W
                s = SHIFT_IDX[(0, (t - 1) * dil)]
                wt = w[:, :, 0, t]
            wf = wf.at[co:co + c, s * Cin:(s + 1) * Cin].set(wt.astype(jnp.float32))
        co += c
    return wf


def iiwc_forward(x_nchw, params):
    """Pallas implementation of IIWCBlock.forward. Input/output are NCHW."""
    N, Cin, H, W = x_nchw.shape
    bias = jnp.concatenate([params["b_first"], params["b_second"], params["b_third"],
                            params["b_first2"], params["b_second2"], params["b_third2"]])
    Cout = bias.shape[0]

    # Extra right pad so the flattened spatial length H*Wp is a multiple of 128
    # (lane-dense output) whenever that is cheap; correctness never depends on it.
    extra = 0
    for e in range(0, 33):
        if (H * (W + 2 * PAD + e)) % 128 == 0:
            extra = e
            break
    Wp = W + 2 * PAD + extra
    Hp = H + 2 * PAD
    L = H * Wp                       # flat compute length (H output rows x Wp cols)
    Lp = Hp * Wp + 2 * GUARD

    # Pad H/W with zeros, flatten (H, W) -> one lane axis, add flat guard.
    x = x_nchw.astype(jnp.float32)
    xp = jnp.pad(x, ((0, 0), (0, 0), (PAD, PAD), (PAD, PAD + extra)))
    xf = jnp.pad(xp.reshape(N, Cin, Hp * Wp), ((0, 0), (0, 0), (GUARD, GUARD)))

    # Static slice start (into the guarded flat axis) of each of the 13 taps.
    shift_starts = tuple(GUARD + (PAD + dh) * Wp + dw for dh, dw in SHIFTS)

    wf = _build_fused_weight(params, Cin, Cout)               # (Cout, 13*Cin)
    bias2d = bias.reshape(Cout, 1).astype(jnp.float32)
    gamma2d = params["gamma"].reshape(Cout, 1).astype(jnp.float32)
    beta2d = params["beta"].reshape(Cout, 1).astype(jnp.float32)

    # Validity mask along the flat axis (1.0 inside the original W columns).
    col = jnp.arange(L, dtype=jnp.int32) % Wp
    mask = ((col >= PAD) & (col < PAD + W)).astype(jnp.float32).reshape(1, L)

    K = NSHIFT * Cin

    conv_fn = functools.partial(conv_kernel, shift_starts=shift_starts, L=L)
    feat, stats = pl.pallas_call(
        conv_fn,
        out_shape=(jax.ShapeDtypeStruct((N, Cout, L), jnp.float32),
                   jax.ShapeDtypeStruct((N, Cout, 2), jnp.float32)),
        grid=(N,),
        in_specs=[pl.BlockSpec((1, Cin, Lp), lambda n: (n, 0, 0)),
                  pl.BlockSpec((Cout, K), lambda n: (0, 0)),
                  pl.BlockSpec((Cout, 1), lambda n: (0, 0)),
                  pl.BlockSpec((1, L), lambda n: (0, 0))],
        out_specs=(pl.BlockSpec((1, Cout, L), lambda n: (n, 0, 0)),
                   pl.BlockSpec((1, Cout, 2), lambda n: (n, 0, 0))),
        compiler_params=pltpu.CompilerParams(dimension_semantics=("parallel",)),
    )(xf, wf, bias2d, mask)

    bn_fn = functools.partial(bn_relu_kernel, inv_count=1.0 / float(N * H * W))
    out_flat = pl.pallas_call(
        bn_fn,
        out_shape=jax.ShapeDtypeStruct((N, Cout, L), jnp.float32),
        grid=(N,),
        in_specs=[pl.BlockSpec((1, Cout, L), lambda n: (n, 0, 0)),
                  pl.BlockSpec((N, Cout, 2), lambda n: (0, 0, 0)),
                  pl.BlockSpec((Cout, 1), lambda n: (0, 0)),
                  pl.BlockSpec((Cout, 1), lambda n: (0, 0))],
        out_specs=pl.BlockSpec((1, Cout, L), lambda n: (n, 0, 0)),
        compiler_params=pltpu.CompilerParams(dimension_semantics=("parallel",)),
    )(feat, stats, gamma2d, beta2d)

    # Un-flatten and drop the W padding columns; output is already NCHW.
    return out_flat.reshape(N, Cout, H, Wp)[:, :, :, PAD:PAD + W]


# ---------------------------------------------------------------------------
# Parameters + pure-JAX reference (training-mode BN), for the built-in check.
# ---------------------------------------------------------------------------
def make_params(input_nc, output_nc, key):
    temp = output_nc // 2
    c1 = c2 = temp // 3
    c3 = temp - 2 * c1
    ks = jax.random.split(key, 15)
    s = 0.1
    p = {
        "w_first":   s * jax.random.normal(ks[0], (c1, input_nc, KSIZE, 1), jnp.float32),
        "w_second":  s * jax.random.normal(ks[1], (c2, input_nc, KSIZE, 1), jnp.float32),
        "w_third":   s * jax.random.normal(ks[2], (c3, input_nc, KSIZE, 1), jnp.float32),
        "w_first2":  s * jax.random.normal(ks[3], (c1, input_nc, 1, KSIZE), jnp.float32),
        "w_second2": s * jax.random.normal(ks[4], (c2, input_nc, 1, KSIZE), jnp.float32),
        "w_third2":  s * jax.random.normal(ks[5], (c3, input_nc, 1, KSIZE), jnp.float32),
        "b_first":   s * jax.random.normal(ks[6], (c1,), jnp.float32),
        "b_second":  s * jax.random.normal(ks[7], (c2,), jnp.float32),
        "b_third":   s * jax.random.normal(ks[8], (c3,), jnp.float32),
        "b_first2":  s * jax.random.normal(ks[9], (c1,), jnp.float32),
        "b_second2": s * jax.random.normal(ks[10], (c2,), jnp.float32),
        "b_third2":  s * jax.random.normal(ks[11], (c3,), jnp.float32),
        "gamma": 1.0 + s * jax.random.normal(ks[12], (2 * temp,), jnp.float32),
        "beta":  s * jax.random.normal(ks[13], (2 * temp,), jnp.float32),
    }
    return p


def reference_forward(x_nchw, p):
    """Pure-JAX reference reproducing the PyTorch forward (training-mode BN)."""
    def conv(x, w, b, dil, pad):
        y = jax.lax.conv_general_dilated(
            x, w, window_strides=(1, 1), padding=pad, rhs_dilation=dil,
            dimension_numbers=("NCHW", "OIHW", "NCHW"))
        return y + b.reshape(1, -1, 1, 1)

    o1 = conv(x_nchw, p["w_first"],   p["b_first"],   (1, 1), ((1, 1), (0, 0)))
    o2 = conv(x_nchw, p["w_second"],  p["b_second"],  (2, 1), ((2, 2), (0, 0)))
    o3 = conv(x_nchw, p["w_third"],   p["b_third"],   (3, 1), ((3, 3), (0, 0)))
    o4 = conv(x_nchw, p["w_first2"],  p["b_first2"],  (1, 1), ((0, 0), (1, 1)))
    o5 = conv(x_nchw, p["w_second2"], p["b_second2"], (1, 2), ((0, 0), (2, 2)))
    o6 = conv(x_nchw, p["w_third2"],  p["b_third2"],  (1, 3), ((0, 0), (3, 3)))
    f = jnp.concatenate([o1, o2, o3, o4, o5, o6], axis=1)

    mean = jnp.mean(f, axis=(0, 2, 3), keepdims=True)
    var = jnp.mean((f - mean) ** 2, axis=(0, 2, 3), keepdims=True)
    y = (f - mean) * jax.lax.rsqrt(var + BN_EPS)
    y = y * p["gamma"].reshape(1, -1, 1, 1) + p["beta"].reshape(1, -1, 1, 1)
    return jnp.maximum(y, 0.0)


if __name__ == "__main__":
    # Small shapes consistent with the module: input_nc=4, output_nc=12 -> Cout=12.
    N, Cin, H, W = 2, 4, 16, 16
    output_nc = 12

    key = jax.random.PRNGKey(0)
    kx, kp = jax.random.split(key)
    x = jax.random.normal(kx, (N, Cin, H, W), jnp.float32)   # NCHW, like PyTorch
    params = make_params(Cin, output_nc, kp)

    out = jax.jit(iiwc_forward)(x, params)
    out = jax.block_until_ready(out)

    ref = reference_forward(x, params)
    np.testing.assert_allclose(np.asarray(out), np.asarray(ref), rtol=2e-4, atol=2e-4)

    print("KERNEL_OK")
</pallas_src>

<mosaic_0001>
module attributes {stable_mosaic.version = 11 : i64} {
  func.func @conv_kernel(%arg0: i32, %arg1: memref<1x4x534xf32, #tpu.memory_space<vmem>>, %arg2: memref<12x52xf32, #tpu.memory_space<vmem>>, %arg3: memref<12x1xf32, #tpu.memory_space<vmem>>, %arg4: memref<1x384xf32, #tpu.memory_space<vmem>>, %arg5: memref<1x12x384xf32, #tpu.memory_space<vmem>>, %arg6: memref<1x12x2xf32, #tpu.memory_space<vmem>>) attributes {dimension_semantics = [#tpu.dimension_semantics<parallel>], iteration_bounds = array<i64: 2>, scalar_prefetch = 0 : i64, scratch_operands = 0 : i64, tpu.core_type = #tpu.core_type<tc>, window_params = [{transform_indices = @transform_0, window_bounds = array<i64: 1, 4, 534>}, {pipeline_mode = #tpu.pipeline_mode<synchronous>, transform_indices = @transform_1, window_bounds = array<i64: 12, 52>}, {pipeline_mode = #tpu.pipeline_mode<synchronous>, transform_indices = @transform_2, window_bounds = array<i64: 12, 1>}, {pipeline_mode = #tpu.pipeline_mode<synchronous>, transform_indices = @transform_3, window_bounds = array<i64: 1, 384>}, {transform_indices = @transform_4, window_bounds = array<i64: 1, 12, 384>}, {transform_indices = @transform_5, window_bounds = array<i64: 1, 12, 2>}]} {
    %c0 = arith.constant 0 : index
    %c0_0 = arith.constant 0 : index
    %c3 = arith.constant 3 : index
    %0 = vector.load %arg1[%c0, %c0_0, %c3] : memref<1x4x534xf32, #tpu.memory_space<vmem>>, vector<1x4x384xf32>
    %1 = vector.shape_cast %0 : vector<1x4x384xf32> to vector<4x384xf32>
    %c0_1 = arith.constant 0 : index
    %c0_2 = arith.constant 0 : index
    %c27 = arith.constant 27 : index
    %2 = vector.load %arg1[%c0_1, %c0_2, %c27] : memref<1x4x534xf32, #tpu.memory_space<vmem>>, vector<1x4x384xf32>
    %3 = vector.shape_cast %2 : vector<1x4x384xf32> to vector<4x384xf32>
    %c0_3 = arith.constant 0 : index
    %c0_4 = arith.constant 0 : index
    %c51 = arith.constant 51 : index
    %4 = vector.load %arg1[%c0_3, %c0_4, %c51] : memref<1x4x534xf32, #tpu.memory_space<vmem>>, vector<1x4x384xf32>
    %5 = vector.shape_cast %4 : vector<1x4x384xf32> to vector<4x384xf32>
    %c0_5 = arith.constant 0 : index
    %c0_6 = arith.constant 0 : index
    %c75 = arith.constant 75 : index
    %6 = vector.load %arg1[%c0_5, %c0_6, %c75] : memref<1x4x534xf32, #tpu.memory_space<vmem>>, vector<1x4x384xf32>
    %7 = vector.shape_cast %6 : vector<1x4x384xf32> to vector<4x384xf32>
    %c0_7 = arith.constant 0 : index
    %c0_8 = arith.constant 0 : index
    %c99 = arith.constant 99 : index
    %8 = vector.load %arg1[%c0_7, %c0_8, %c99] : memref<1x4x534xf32, #tpu.memory_space<vmem>>, vector<1x4x384xf32>
    %9 = vector.shape_cast %8 : vector<1x4x384xf32> to vector<4x384xf32>
    %c0_9 = arith.constant 0 : index
    %c0_10 = arith.constant 0 : index
    %c123 = arith.constant 123 : index
    %10 = vector.load %arg1[%c0_9, %c0_10, %c123] : memref<1x4x534xf32, #tpu.memory_space<vmem>>, vector<1x4x384xf32>
    %11 = vector.shape_cast %10 : vector<1x4x384xf32> to vector<4x384xf32>
    %c0_11 = arith.constant 0 : index
    %c0_12 = arith.constant 0 : index
    %c147 = arith.constant 147 : index
    %12 = vector.load %arg1[%c0_11, %c0_12, %c147] : memref<1x4x534xf32, #tpu.memory_space<vmem>>, vector<1x4x384xf32>
    %13 = vector.shape_cast %12 : vector<1x4x384xf32> to vector<4x384xf32>
    %c0_13 = arith.constant 0 : index
    %c0_14 = arith.constant 0 : index
    %c72 = arith.constant 72 : index
    %14 = vector.load %arg1[%c0_13, %c0_14, %c72] : memref<1x4x534xf32, #tpu.memory_space<vmem>>, vector<1x4x384xf32>
    %15 = vector.shape_cast %14 : vector<1x4x384xf32> to vector<4x384xf32>
    %c0_15 = arith.constant 0 : index
    %c0_16 = arith.constant 0 : index
    %c73 = arith.constant 73 : index
    %16 = vector.load %arg1[%c0_15, %c0_16, %c73] : memref<1x4x534xf32, #tpu.memory_space<vmem>>, vector<1x4x384xf32>
    %17 = vector.shape_cast %16 : vector<1x4x384xf32> to vector<4x384xf32>
    %c0_17 = arith.constant 0 : index
    %c0_18 = arith.constant 0 : index
    %c74 = arith.constant 74 : index
    %18 = vector.load %arg1[%c0_17, %c0_18, %c74] : memref<1x4x534xf32, #tpu.memory_space<vmem>>, vector<1x4x384xf32>
    %19 = vector.shape_cast %18 : vector<1x4x384xf32> to vector<4x384xf32>
    %c0_19 = arith.constant 0 : index
    %c0_20 = arith.constant 0 : index
    %c76 = arith.constant 76 : index
    %20 = vector.load %arg1[%c0_19, %c0_20, %c76] : memref<1x4x534xf32, #tpu.memory_space<vmem>>, vector<1x4x384xf32>
    %21 = vector.shape_cast %20 : vector<1x4x384xf32> to vector<4x384xf32>
    %c0_21 = arith.constant 0 : index
    %c0_22 = arith.constant 0 : index
    %c77 = arith.constant 77 : index
    %22 = vector.load %arg1[%c0_21, %c0_22, %c77] : memref<1x4x534xf32, #tpu.memory_space<vmem>>, vector<1x4x384xf32>
    %23 = vector.shape_cast %22 : vector<1x4x384xf32> to vector<4x384xf32>
    %c0_23 = arith.constant 0 : index
    %c0_24 = arith.constant 0 : index
    %c78 = arith.constant 78 : index
    %24 = vector.load %arg1[%c0_23, %c0_24, %c78] : memref<1x4x534xf32, #tpu.memory_space<vmem>>, vector<1x4x384xf32>
    %25 = vector.shape_cast %24 : vector<1x4x384xf32> to vector<4x384xf32>
    %26 = tpu.concatenate %1, %3, %5, %7, %9, %11, %13, %15, %17, %19, %21, %23, %25 in 0 : vector<4x384xf32>, vector<4x384xf32>, vector<4x384xf32>, vector<4x384xf32>, vector<4x384xf32>, vector<4x384xf32>, vector<4x384xf32>, vector<4x384xf32>, vector<4x384xf32>, vector<4x384xf32>, vector<4x384xf32>, vector<4x384xf32>, vector<4x384xf32> -> vector<52x384xf32>
    %c0_25 = arith.constant 0 : index
    %c0_26 = arith.constant 0 : index
    %27 = vector.load %arg2[%c0_25, %c0_26] : memref<12x52xf32, #tpu.memory_space<vmem>>, vector<12x52xf32>
    %cst = arith.constant dense<0.000000e+00> : vector<12x384xf32>
    %28 = tpu.matmul %27, %26, %cst {dimension_numbers = #tpu.dot_dimension_numbers<[1], [0], [0], [1], [0, 0, 1, 1], [], []>} : vector<12x52xf32>, vector<52x384xf32>, vector<12x384xf32> -> vector<12x384xf32>
    %c0_27 = arith.constant 0 : index
    %c0_28 = arith.constant 0 : index
    %29 = vector.load %arg3[%c0_27, %c0_28] : memref<12x1xf32, #tpu.memory_space<vmem>>, vector<12x1xf32>
    %30 = vector.broadcast %29 : vector<12x1xf32> to vector<12x384xf32>
    %31 = arith.addf %28, %30 : vector<12x384xf32>
    %c0_29 = arith.constant 0 : index
    %c0_30 = arith.constant 0 : index
    %32 = vector.load %arg4[%c0_29, %c0_30] : memref<1x384xf32, #tpu.memory_space<vmem>>, vector<1x384xf32>
    %33 = vector.broadcast %32 : vector<1x384xf32> to vector<12x384xf32>
    %34 = arith.mulf %31, %33 : vector<12x384xf32>
    %c0_31 = arith.constant 0 : index
    %c0_32 = arith.constant 0 : index
    %c0_33 = arith.constant 0 : index
    %35 = vector.load %arg5[%c0_31, %c0_32, %c0_33] : memref<1x12x384xf32, #tpu.memory_space<vmem>>, vector<1x12x384xf32>
    %36 = vector.shape_cast %35 : vector<1x12x384xf32> to vector<12x384xf32>
    %37 = vector.shape_cast %34 : vector<12x384xf32> to vector<1x12x384xf32>
    tpu.vector_store %arg5[%c0_31, %c0_32, %c0_33], %37 {strides = array<i32>} : memref<1x12x384xf32, #tpu.memory_space<vmem>>, vector<1x12x384xf32>,
    %cst_34 = arith.constant dense<0.000000e+00> : vector<12xf32>
    %38 = vector.multi_reduction <add>, %34, %cst_34 [1] : vector<12x384xf32> to vector<12xf32>
    %39 = vector.shape_cast %38 : vector<12xf32> to vector<12x1xf32>
    %40 = arith.mulf %34, %34 : vector<12x384xf32>
    %cst_35 = arith.constant dense<0.000000e+00> : vector<12xf32>
    %41 = vector.multi_reduction <add>, %40, %cst_35 [1] : vector<12x384xf32> to vector<12xf32>
    %42 = vector.shape_cast %41 : vector<12xf32> to vector<12x1xf32>
    %43 = tpu.concatenate %39, %42 in 1 : vector<12x1xf32>, vector<12x1xf32> -> vector<12x2xf32>
    %c0_36 = arith.constant 0 : index
    %c0_37 = arith.constant 0 : index
    %c0_38 = arith.constant 0 : index
    %44 = vector.load %arg6[%c0_36, %c0_37, %c0_38] : memref<1x12x2xf32, #tpu.memory_space<vmem>>, vector<1x12x2xf32>
    %45 = vector.shape_cast %44 : vector<1x12x2xf32> to vector<12x2xf32>
    %46 = vector.shape_cast %43 : vector<12x2xf32> to vector<1x12x2xf32>
    tpu.vector_store %arg6[%c0_36, %c0_37, %c0_38], %46 {strides = array<i32>} : memref<1x12x2xf32, #tpu.memory_space<vmem>>, vector<1x12x2xf32>,
    return
  }
  func.func @transform_0(%arg0: i32) -> (i32, i32, i32) {
    %c0_i32 = arith.constant 0 : i32
    %c0_i32_0 = arith.constant 0 : i32
    %c0_i32_1 = arith.constant 0 : i32
    return %arg0, %c0_i32, %c0_i32_0 : i32, i32, i32
  }
  func.func @transform_1(%arg0: i32) -> (i32, i32) {
    %c0_i32 = arith.constant 0 : i32
    %c0_i32_0 = arith.constant 0 : i32
    %c0_i32_1 = arith.constant 0 : i32
    return %c0_i32, %c0_i32_0 : i32, i32
  }
  func.func @transform_2(%arg0: i32) -> (i32, i32) {
    %c0_i32 = arith.constant 0 : i32
    %c0_i32_0 = arith.constant 0 : i32
    %c0_i32_1 = arith.constant 0 : i32
    return %c0_i32, %c0_i32_0 : i32, i32
  }
  func.func @transform_3(%arg0: i32) -> (i32, i32) {
    %c0_i32 = arith.constant 0 : i32
    %c0_i32_0 = arith.constant 0 : i32
    %c0_i32_1 = arith.constant 0 : i32
    return %c0_i32, %c0_i32_0 : i32, i32
  }
  func.func @transform_4(%arg0: i32) -> (i32, i32, i32) {
    %c0_i32 = arith.constant 0 : i32
    %c0_i32_0 = arith.constant 0 : i32
    %c0_i32_1 = arith.constant 0 : i32
    return %arg0, %c0_i32, %c0_i32_0 : i32, i32, i32
  }
  func.func @transform_5(%arg0: i32) -> (i32, i32, i32) {
    %c0_i32 = arith.constant 0 : i32
    %c0_i32_0 = arith.constant 0 : i32
    %c0_i32_1 = arith.constant 0 : i32
    return %arg0, %c0_i32, %c0_i32_0 : i32, i32, i32
  }
}

module attributes {stable_mosaic.version = 11 : i64} {
  func.func @bn_relu_kernel(%arg0: i32, %arg1: memref<1x12x384xf32, #tpu.memory_space<vmem>>, %arg2: memref<2x12x2xf32, #tpu.memory_space<vmem>>, %arg3: memref<12x1xf32, #tpu.memory_space<vmem>>, %arg4: memref<12x1xf32, #tpu.memory_space<vmem>>, %arg5: memref<1x12x384xf32, #tpu.memory_space<vmem>>) attributes {dimension_semantics = [#tpu.dimension_semantics<parallel>], iteration_bounds = array<i64: 2>, scalar_prefetch = 0 : i64, scratch_operands = 0 : i64, tpu.core_type = #tpu.core_type<tc>, window_params = [{transform_indices = @transform_0, window_bounds = array<i64: 1, 12, 384>}, {pipeline_mode = #tpu.pipeline_mode<synchronous>, transform_indices = @transform_1, window_bounds = array<i64: 2, 12, 2>}, {pipeline_mode = #tpu.pipeline_mode<synchronous>, transform_indices = @transform_2, window_bounds = array<i64: 12, 1>}, {pipeline_mode = #tpu.pipeline_mode<synchronous>, transform_indices = @transform_3, window_bounds = array<i64: 12, 1>}, {transform_indices = @transform_4, window_bounds = array<i64: 1, 12, 384>}]} {
    %c0 = arith.constant 0 : index
    %c0_0 = arith.constant 0 : index
    %c0_1 = arith.constant 0 : index
    %0 = vector.load %arg2[%c0, %c0_0, %c0_1] : memref<2x12x2xf32, #tpu.memory_space<vmem>>, vector<2x12x2xf32>
    %cst = arith.constant dense<0.000000e+00> : vector<12x2xf32>
    %1 = vector.multi_reduction <add>, %0, %cst [0] : vector<2x12x2xf32> to vector<12x2xf32>
    %2 = vector.extract_strided_slice %1 {offsets = [0, 0], sizes = [12, 1], strides = [1, 1]} : vector<12x2xf32> to vector<12x1xf32>
    %cst_2 = arith.constant 0.001953125 : f32
    %3 = vector.broadcast %cst_2 : f32 to vector<12x1xf32>
    %4 = arith.mulf %2, %3 : vector<12x1xf32>
    %5 = vector.extract_strided_slice %1 {offsets = [0, 1], sizes = [12, 1], strides = [1, 1]} : vector<12x2xf32> to vector<12x1xf32>
    %cst_3 = arith.constant 0.001953125 : f32
    %6 = vector.broadcast %cst_3 : f32 to vector<12x1xf32>
    %7 = arith.mulf %5, %6 : vector<12x1xf32>
    %8 = arith.mulf %4, %4 : vector<12x1xf32>
    %9 = arith.subf %7, %8 : vector<12x1xf32>
    %cst_4 = arith.constant 9.99999974E-6 : f32
    %10 = vector.broadcast %cst_4 : f32 to vector<12x1xf32>
    %11 = arith.addf %9, %10 : vector<12x1xf32>
    %12 = math.rsqrt %11 : vector<12x1xf32>
    %c0_5 = arith.constant 0 : index
    %c0_6 = arith.constant 0 : index
    %13 = vector.load %arg3[%c0_5, %c0_6] : memref<12x1xf32, #tpu.memory_space<vmem>>, vector<12x1xf32>
    %14 = arith.mulf %13, %12 : vector<12x1xf32>
    %c0_7 = arith.constant 0 : index
    %c0_8 = arith.constant 0 : index
    %15 = vector.load %arg4[%c0_7, %c0_8] : memref<12x1xf32, #tpu.memory_space<vmem>>, vector<12x1xf32>
    %16 = arith.mulf %4, %14 : vector<12x1xf32>
    %17 = arith.subf %15, %16 : vector<12x1xf32>
    %c0_9 = arith.constant 0 : index
    %c0_10 = arith.constant 0 : index
    %c0_11 = arith.constant 0 : index
    %18 = vector.load %arg1[%c0_9, %c0_10, %c0_11] : memref<1x12x384xf32, #tpu.memory_space<vmem>>, vector<1x12x384xf32>
    %19 = vector.shape_cast %18 : vector<1x12x384xf32> to vector<12x384xf32>
    %20 = vector.broadcast %14 : vector<12x1xf32> to vector<12x384xf32>
    %21 = arith.mulf %19, %20 : vector<12x384xf32>
    %22 = vector.broadcast %17 : vector<12x1xf32> to vector<12x384xf32>
    %23 = arith.addf %21, %22 : vector<12x384xf32>
    %cst_12 = arith.constant 0.000000e+00 : f32
    %24 = vector.broadcast %cst_12 : f32 to vector<12x384xf32>
    %25 = arith.maximumf %23, %24 : vector<12x384xf32>
    %c0_13 = arith.constant 0 : index
    %c0_14 = arith.constant 0 : index
    %c0_15 = arith.constant 0 : index
    %26 = vector.load %arg5[%c0_13, %c0_14, %c0_15] : memref<1x12x384xf32, #tpu.memory_space<vmem>>, vector<1x12x384xf32>
    %27 = vector.shape_cast %26 : vector<1x12x384xf32> to vector<12x384xf32>
    %28 = vector.shape_cast %25 : vector<12x384xf32> to vector<1x12x384xf32>
    tpu.vector_store %arg5[%c0_13, %c0_14, %c0_15], %28 {strides = array<i32>} : memref<1x12x384xf32, #tpu.memory_space<vmem>>, vector<1x12x384xf32>,
    return
  }
  func.func @transform_0(%arg0: i32) -> (i32, i32, i32) {
    %c0_i32 = arith.constant 0 : i32
    %c0_i32_0 = arith.constant 0 : i32
    %c0_i32_1 = arith.constant 0 : i32
    return %arg0, %c0_i32, %c0_i32_0 : i32, i32, i32
  }
  func.func @transform_1(%arg0: i32) -> (i32, i32, i32) {
    %c0_i32 = arith.constant 0 : i32
    %c0_i32_0 = arith.constant 0 : i32
    %c0_i32_1 = arith.constant 0 : i32
    %c0_i32_2 = arith.constant 0 : i32
    return %c0_i32, %c0_i32_0, %c0_i32_1 : i32, i32, i32
  }
  func.func @transform_2(%arg0: i32) -> (i32, i32) {
    %c0_i32 = arith.constant 0 : i32
    %c0_i32_0 = arith.constant 0 : i32
    %c0_i32_1 = arith.constant 0 : i32
    return %c0_i32, %c0_i32_0 : i32, i32
  }
  func.func @transform_3(%arg0: i32) -> (i32, i32) {
    %c0_i32 = arith.constant 0 : i32
    %c0_i32_0 = arith.constant 0 : i32
    %c0_i32_1 = arith.constant 0 : i32
    return %c0_i32, %c0_i32_0 : i32, i32
  }
  func.func @transform_4(%arg0: i32) -> (i32, i32, i32) {
    %c0_i32 = arith.constant 0 : i32
    %c0_i32_0 = arith.constant 0 : i32
    %c0_i32_1 = arith.constant 0 : i32
    return %arg0, %c0_i32, %c0_i32_0 : i32, i32, i32
  }
}

</mosaic_0001>

<bundles_post_ra>
// kernel: iiwc_forward.3
= control target key start
LH: loop header
LB: loop body
LE: loop exit
PB: predicated region body
PF: predicated region fallthrough
CT: control target
= control target key end

     0   :  { %s414_s15 = smov 0   ;;  %s459_s0 = inlined_call_operand.vmem [shape: f32[2,12,384], index: 0, kind: input, shape index: {}]   ;;  %s460_s1 = inlined_call_operand.vmem [shape: f32[2,12,2], index: 1, kind: input, shape index: {}]   ;;  %s461_s2 = inlined_call_operand.vmem [shape: f32[12,1], index: 2, kind: input, shape index: {}]   ;;  %s462_s3 = inlined_call_operand.vmem [shape: f32[12,1], index: 3, kind: input, shape index: {}]   ;;  %s463_s4 = inlined_call_operand.vmem [shape: f32[2,12,384], index: 4, kind: output, shape index: {}]  }
   0x1 LB: > { %s351_s16 = sadd.s32 4294967295, %s384_s15   ;;  %p355_p0 = scmp.ge.s32.totalorder %s384_s15, 1  ;;  %s384_s15 = sphi %s414_s15, %s14_s15  }
   0x2   : > { %p162_p1 = scmp.lt.s32.totalorder %s384_s15, 3 }
   0x4   : > { %p163_p2 = pnand %p355_p0, %p162_p1 }
   0x5   : > { %v198_v0 = vld [vmem:[%s460_s1] sm:$0xff] (!%p163_p2)  ;;  %v200_v1 = vld [vmem:[%s460_s1 + $0x10] sm:$0xff] (!%p163_p2)  ;;  %vm202_vm0 = vcmask (!%p163_p2), 15360   ;;  %v199_v2 = vld [vmem:[%s460_s1 + $0x8] sm:$0xf] (!%p163_p2)  ;;  %vm206_vm1 = vcmask (!%p163_p2), 11264  }
   0x6   : > { %166 = sbr.rel (%p163_p2) target bundleno = 403 (0x193), region = 36  ;;  %v203_v3 = vsel (!%p163_p2), %vm202_vm0, %v198_v0, 0.0  ;;  %v204_v4 = vsel (!%p163_p2), %vm202_vm0, %v200_v1, 0.0  ;;  %v201_v5 = vld [vmem:[%s460_s1 + $0x18] sm:$0xf] (!%p163_p2)  ;;  %v207_v7 = vsel (!%p163_p2), %vm206_vm1, %v199_v2, 0.0 }
   0x7   : > { %v205_v6 = vadd.f32 (!%p163_p2), %v204_v4, %v203_v3  ;;  %v208_v8 = vsel (!%p163_p2), %vm206_vm1, %v201_v5, 0.0  ;;  %s386_s25 = smov (!%p163_p2), 1   ;;  %v387_v18 = vmov (!%p163_p2), 0   ;;  %s388_s26 = smov (!%p163_p2), 127   ;;  %v228_v23 = vld [vmem:[%s461_s2] sm:$0xff] (!%p163_p2) }
   0x8   : > { %v209_v9 = vadd.f32 (!%p163_p2), %v208_v8, %v207_v7  ;;  %372 = vset.pattern.permute.xlu0 (!%p163_p2), %v387_v18  ;;  %373 = vset.pattern.permute.xlu1 (!%p163_p2), %v387_v18  ;;  %v229_v26 = vld [vmem:[%s461_s2 + $0x8] sm:$0xf] (!%p163_p2)  ;;  %v240_v30 = vld [vmem:[%s462_s3] sm:$0xff] (!%p163_p2)  ;;  %p188_p3 = scmp.lt.s32.totalorder (!%p163_p2), %s351_s16, 1 }
   0x9   : > { %v210_v10 = vmul.f32 (!%p163_p2), 0.001953125, %v205_v6  ;;  %v241_v31 = vld [vmem:[%s462_s3 + $0x8] sm:$0xf] (!%p163_p2) }
   0xa   : > { %v211_v11 = vmul.f32 (!%p163_p2), 0.001953125, %v209_v9 }
   0xb   : > { %v212_v12 = vmul.f32 (!%p163_p2), %v210_v10, %v210_v10 }
   0xc   : > { %v213_v13 = vmul.f32 (!%p163_p2), %v211_v11, %v211_v11 }
   0xd   : > { %216 = vrot.lane.b32.xlu0 %v212_v12, %s386_s25  ;;  %s465_s16 = smov (!%p188_p3, %s351_s16), 1 }
   0xe   : > { %s360_s9 = smul.u32 48, %s465_s16 }
  0x10   : > { %s192_s12 = scalar_lea.vmem %s459_s0, %s360_s9  ;;  %s197_s16 = scalar_lea.vmem %s463_s4, %s360_s9 }
  0x11   : > { %218 = vrot.lane.b32.xlu0 %v213_v13, %s386_s25  ;;  %v246_v35 = vld [vmem:[%s192_s12] sm:$0xff]  ;;  %v247_v37 = vld [vmem:[%s192_s12 + $0x8] sm:$0xff]  ;;  %v248_v38 = vld [vmem:[%s192_s12 + $0x10] sm:$0xff] }
  0x12   : > { %v249_v40 = vld [vmem:[%s192_s12 + $0x18] sm:$0xf]  ;;  %v250_v41 = vld [vmem:[%s192_s12 + $0x20] sm:$0xf]  ;;  %v251_v42 = vld [vmem:[%s192_s12 + $0x28] sm:$0xf] }
  0x7f   : > { %v217_v14 = vpop.permute.xlu0 %216 }
  0x80   : > { %v222_v15 = vsub.f32 %v210_v10, %v217_v14 }
  0x82   : > { %v224_v16 = vadd.f32 1e-05, %v222_v15 }
  0x83   : > { %v219_v17 = vpop.permute.xlu0 %218 }
  0x84   : > { %374 = vrsqrt.f32 %v224_v16  ;;  %v223_v19 = vsub.f32 %v211_v11, %v219_v17 }
  0x86   : > { %v225_v20 = vadd.f32 1e-05, %v223_v19 }
  0x88   : > { %376 = vrsqrt.f32 %v225_v20 }
  0x8e   : > { %v375_v21 = vpop.eup %374 }
  0x8f   : > { %232 = vrot.lane.b32.xlu1 %v375_v21, %s388_s26 }
  0x92   : > { %v377_v22 = vpop.eup %376 }
  0x93   : > { %234 = vrot.lane.b32.xlu1 %v377_v22, %s388_s26 }
 0x101   : > { %v233_v24 = vpop.permute.xlu1 %232 }
 0x102   : > { %v238_v25 = vmul.f32 %v233_v24, %v228_v23 }
 0x104   : > { %254 = vperm.xlu0 %372, %v238_v25   ;;  %v242_v28 = vmul.f32 %v238_v25, %v210_v10 }
 0x105   : > { %v235_v27 = vpop.permute.xlu1 %234 }
 0x106   : > { %v239_v29 = vmul.f32 %v235_v27, %v229_v26  ;;  %v244_v33 = vsub.f32 %v240_v30, %v242_v28 }
 0x108   : > { %v243_v32 = vmul.f32 %v239_v29, %v211_v11  ;;  %259 = vperm.xlu1 %373, %v239_v29  }
 0x10a   : > { %v245_v34 = vsub.f32 %v241_v31, %v243_v32 }
 0x10c   : > { %270 = vperm.xlu1 %373, %v244_v33   ;;  %275 = vperm.xlu0 %372, %v245_v34  }
 0x183   : > { %v255_v36 = vpop.permute.xlu0 %254 }
 0x184   : > { %v262_v43 = vmul.f32 %v255_v36, %v246_v35  ;;  %v263_v44 = vmul.f32 %v255_v36, %v247_v37  ;;  %v264_v45 = vmul.f32 %v255_v36, %v248_v38 }
 0x187   : > { %v260_v39 = vpop.permute.xlu1 %259 }
 0x188   : > { %v265_v46 = vmul.f32 %v260_v39, %v249_v40  ;;  %v266_v47 = vmul.f32 %v260_v39, %v250_v41  ;;  %v267_v48 = vmul.f32 %v260_v39, %v251_v42 }
 0x18b   : > { %v271_v49 = vpop.permute.xlu1 %270  ;;  %v276_v50 = vpop.permute.xlu0 %275 }
 0x18c   : > { %v278_v51 = vadd.f32 %v271_v49, %v262_v43  ;;  %v279_v52 = vadd.f32 %v271_v49, %v263_v44  ;;  %v280_v53 = vadd.f32 %v271_v49, %v264_v45  ;;  %v281_v54 = vadd.f32 %v276_v50, %v265_v46 }
 0x18d   : > { %v282_v55 = vadd.f32 %v276_v50, %v266_v47  ;;  %v283_v56 = vadd.f32 %v276_v50, %v267_v48 }
 0x18e   : > { %v284_v57 = vmax.f32 %v278_v51, 0.0  ;;  %v285_v58 = vmax.f32 %v279_v52, 0.0  ;;  %v286_v59 = vmax.f32 %v280_v53, 0.0  ;;  %v287_v60 = vmax.f32 %v281_v54, 0.0 }
 0x18f   : > { %v288_v61 = vmax.f32 %v282_v55, 0.0  ;;  %v289_v62 = vmax.f32 %v283_v56, 0.0 }
 0x190   : > { %290 = vst [vmem:[%s197_s16] sm:$0xff] %v284_v57  ;;  %291 = vst [vmem:[%s197_s16 + $0x8] sm:$0xff] %v285_v58 }
 0x191   : > { %292 = vst [vmem:[%s197_s16 + $0x10] sm:$0xff] %v286_v59  ;;  %293 = vst [vmem:[%s197_s16 + $0x18] sm:$0xf] %v287_v60 }
 0x192   : > { %294 = vst [vmem:[%s197_s16 + $0x20] sm:$0xf] %v288_v61  ;;  %295 = vst [vmem:[%s197_s16 + $0x28] sm:$0xf] %v289_v62 }
 0x193 PF: > { %s14_s15 = sadd.s32 1, %s384_s15  }
 0x194   : > { %p11_p4 = scmp.ge.s32.totalorder %s14_s15, 4  }
 0x196   :  { %13 = sbr.rel (!%p11_p4) target bundleno = 1 (0x1), region = 66 }

// kernel: iiwc_forward.2
= control target key start
LH: loop header
LB: loop body
LE: loop exit
PB: predicated region body
PF: predicated region fallthrough
CT: control target
= control target key end

     0   :  { %s1243_s18 = smov 0   ;;  %s1492_s0 = inlined_call_operand.vmem [shape: f32[2,4,534], index: 0, kind: input, shape index: {}]   ;;  %s1493_s1 = inlined_call_operand.vmem [shape: f32[12,52], index: 1, kind: input, shape index: {}]   ;;  %s1494_s2 = inlined_call_operand.vmem [shape: f32[12,1], index: 2, kind: input, shape index: {}]   ;;  %s1495_s3 = inlined_call_operand.vmem [shape: f32[1,384], index: 3, kind: input, shape index: {}]   ;;  %s1496_s4 = inlined_call_operand.vmem [shape: f32[2,12,384], index: 4, kind: output, shape index: {0}]   ;;  %s1497_s5 = inlined_call_operand.vmem [shape: f32[2,12,2], index: 5, kind: output, shape index: {1}]  }
   0x1 LB: > { %s918_s19 = sadd.s32 4294967295, %s1196_s18   ;;  %p922_p0 = scmp.ge.s32.totalorder %s1196_s18, 1  ;;  %s1196_s18 = sphi %s1243_s18, %s16_s18  }
   0x2   : > { %p190_p1 = scmp.lt.s32.totalorder %s1196_s18, 3 }
   0x4   : > { %p191_p2 = pnand %p922_p0, %p190_p1 }
   0x5   : > { %p223_p3 = scmp.lt.s32.totalorder (!%p191_p2), %s918_s19, 1  ;;  %s1198_s24 = smov (!%p191_p2), 104   ;;  %vm274_vm0 = vcmask (!%p191_p2), 654336   ;;  %vm290_vm1 = vcmask (!%p191_p2), 457728   ;;  %vm442_vm2 = vcmask (!%p191_p2), 1043456   ;;  %vm306_vm3 = vcmask (!%p191_p2), 261120  }
   0x6   : > { %194 = sbr.rel (%p191_p2) target bundleno = 685 (0x2ad), region = 36  ;;  %s1199_s25 = smov (!%p191_p2), 80   ;;  %vm322_vm4 = vcmask (!%p191_p2), 64512   ;;  %vm258_vm5 = vcmask (!%p191_p2), 850944   ;;  %vm342_vm6 = vcmask (!%p191_p2), 916480   ;;  %vm358_vm7 = vcmask (!%p191_p2), 482304  }
   0x7   : > { %s1200_s26 = smov (!%p191_p2), 56   ;;  %s1201_s27 = smov (!%p191_p2), 32   ;;  %vm374_vm8 = vcmask (!%p191_p2), 474112   ;;  %vm390_vm9 = vcmask (!%p191_p2), 465920   ;;  %vm406_vm10 = vcmask (!%p191_p2), 449536   ;;  %vm422_vm11 = vcmask (!%p191_p2), 441344  }
   0x8   : > { %s1202_s28 = smov (!%p191_p2), 8   ;;  %s1203_s29 = smov (!%p191_p2), 112   ;;  %vm438_vm12 = vcmask (!%p191_p2), 433152   ;;  %vm601_vm13 = vcmask (!%p191_p2), 424960   ;;  %vm561_vm14 = vcmask (!%p191_p2), 1022976   ;;  %vm823_vm15 = vcmask (!%p191_p2), 7168  }
   0x9   : > { %s1204_s30 = smov (!%p191_p2), 59   ;;  %s1205_s6 = smov (!%p191_p2), 58  }
   0xa   : > { %s1206_s7 = smov (!%p191_p2), 57   ;;  %s1207_s8 = smov (!%p191_p2), 55  }
   0xb   : > { %s1208_s9 = smov (!%p191_p2), 54   ;;  %s1209_s10 = smov (!%p191_p2), 53  }
   0xc   : > { %s1210_s11 = smov (!%p191_p2), 125  }
   0xd   : > { %s1499_s19 = smov (!%p223_p3, %s918_s19), 1 }
   0xe   : > { %s987_s20 = smul.u32 20, %s1499_s19 }
  0x10   : > { %s227_s23 = scalar_lea.vmem %s1492_s0, %s987_s20 }
  0x11   : > { %v1257_v0 = vld [vmem:[%s227_s23] sm:$0xff]  ;;  %v1259_v1 = vld [vmem:[%s227_s23 + $0x8] sm:$0xff] }
  0x12   : > { %v249_v2 = vcombine.low %v1259_v1, %v1259_v1  ;;  %v1265_v3 = vcombine.high %v1257_v0, %v1257_v0  ;;  %v248_v4 = vcombine.low %v1257_v0, %v1257_v0  ;;  %v1271_v5 = vcombine.high %v1259_v1, %v1259_v1  ;;  %v240_v10 = vld [vmem:[%s227_s23 + $0x4] sm:$0xff]  ;;  %v241_v11 = vld [vmem:[%s227_s23 + $0xc] sm:$0xff] }
  0x13   : > { %v332_v12 = vcombine.high %v240_v10, %v240_v10  ;;  %v333_v13 = vcombine.high %v241_v11, %v241_v11 }
  0x14   : > { %v1012_v6 = vpack.i.bf16 %v249_v2, %v1257_v0  ;;  %v1022_v7 = vpack.i.bf16 %v1259_v1, %v1265_v3  ;;  %v1017_v8 = vpack.i.bf16 %v248_v4, %v1259_v1  ;;  %v1027_v9 = vpack.i.bf16 %v1257_v0, %v1271_v5 }
  0x15   : > { %v1062_v14 = vpack.i.bf16 %v241_v11, %v332_v12  ;;  %v1067_v15 = vpack.i.bf16 %v240_v10, %v333_v13 }
  0x16   : > { %1013 = vrot.lane.b32.xlu0 %v1012_v6, %s1198_s24  ;;  %1023 = vrot.lane.b32.xlu1 %v1022_v7, %s1199_s25 }
  0x1a   : > { %1018 = vrot.lane.b32.xlu0 %v1017_v8, %s1198_s24  ;;  %1028 = vrot.lane.b32.xlu1 %v1027_v9, %s1199_s25  ;;  %s988_s24 = smul.u32 48, %s1499_s19 }
  0x1e   : > { %1033 = vrot.lane.b32.xlu0 %v1012_v6, %s1200_s26  ;;  %1038 = vrot.lane.b32.xlu1 %v1017_v8, %s1200_s26 }
  0x22   : > { %1043 = vrot.lane.b32.xlu0 %v1022_v7, %s1201_s27  ;;  %1048 = vrot.lane.b32.xlu1 %v1027_v9, %s1201_s27  ;;  %s1471_s27 = scalar_lea.vmem %s1496_s4, %s988_s24 }
  0x26   : > { %1053 = vrot.lane.b32.xlu0 %v1012_v6, %s1202_s28  ;;  %1058 = vrot.lane.b32.xlu1 %v1017_v8, %s1202_s28  ;;  %s936_s28 = sshll.u32 %s1499_s19, 4 }
  0x2a   : > { %1063 = vrot.lane.b32.xlu0 %v1062_v14, %s1203_s29  ;;  %1068 = vrot.lane.b32.xlu1 %v1067_v15, %s1203_s29 }
  0x2e   : > { %1073 = vrot.lane.b32.xlu0 %v1012_v6, %s1204_s30  ;;  %1078 = vrot.lane.b32.xlu1 %v1017_v8, %s1204_s30 }
  0x32   : > { %1083 = vrot.lane.b32.xlu0 %v1022_v7, %s1205_s6  ;;  %1088 = vrot.lane.b32.xlu1 %v1027_v9, %s1205_s6  ;;  %s237_s6 = scalar_lea.vmem %s1497_s5, %s936_s28 }
  0x36   : > { %1093 = vrot.lane.b32.xlu0 %v1012_v6, %s1206_s7  ;;  %1098 = vrot.lane.b32.xlu1 %v1017_v8, %s1206_s7 }
  0x3a   : > { %1103 = vrot.lane.b32.xlu0 %v1022_v7, %s1207_s8  ;;  %1108 = vrot.lane.b32.xlu1 %v1027_v9, %s1207_s8 }
  0x3e   : > { %1113 = vrot.lane.b32.xlu0 %v1012_v6, %s1208_s9  ;;  %1118 = vrot.lane.b32.xlu1 %v1017_v8, %s1208_s9 }
  0x42   : > { %434 = vrot.lane.b32.xlu1 %v1259_v1, %s1209_s10  ;;  %432 = vrot.lane.b32.xlu0 %v1265_v3, %s1209_s10 }
  0x46   : > { %430 = vrot.lane.b32.xlu1 %v1257_v0, %s1209_s10  ;;  %436 = vrot.lane.b32.xlu0 %v1271_v5, %s1209_s10 }
  0x88   : > { %v1283_v16 = vpop.permute.xlu0 %1013  ;;  %v1285_v17 = vpop.permute.xlu1 %1023 }
  0x89   : > { %v1026_v20 = vunpack.i.h.bf16 %v1285_v17  ;;  %v1025_v21 = vunpack.i.l.bf16 %v1285_v17  ;;  %v1016_v57 = vunpack.i.h.bf16 %v1283_v16  ;;  %v1015_v58 = vunpack.i.l.bf16 %v1283_v16 }
  0x8b   : > { %v276_v29 = vsel %vm274_vm0, %v1025_v21, %v1026_v20  ;;  %v260_v11 = vsel %vm258_vm5, %v1015_v58, %v1016_v57 }
  0x8c   : > { %v1287_v18 = vpop.permute.xlu0 %1018  ;;  %v1289_v19 = vpop.permute.xlu1 %1028 }
  0x8d   : > { %v1030_v22 = vunpack.i.l.bf16 %v1289_v19  ;;  %v1020_v23 = vunpack.i.l.bf16 %v1287_v18  ;;  %v1021_v63 = vunpack.i.h.bf16 %v1287_v18  ;;  %v1031_v13 = vunpack.i.h.bf16 %v1289_v19 }
  0x8f   : > { %v277_v30 = vsel %vm274_vm0, %v1026_v20, %v1030_v22  ;;  %v446_v33 = vsel %vm442_vm2, %v1271_v5, %v1020_v23  ;;  %v261_v12 = vsel %vm258_vm5, %v1016_v57, %v1020_v23 }
  0x90   : > { %v1295_v24 = vpop.permute.xlu0 %1033  ;;  %v1297_v25 = vpop.permute.xlu1 %1038 }
  0x91   : > { %v1036_v26 = vunpack.i.h.bf16 %v1295_v24  ;;  %v1035_v27 = vunpack.i.l.bf16 %v1295_v24  ;;  %v1040_v28 = vunpack.i.l.bf16 %v1297_v25  ;;  %v1041_v2 = vunpack.i.h.bf16 %v1297_v25 }
  0x92   : > { %v445_v24 = vsel %vm442_vm2, %v1259_v1, %v261_v12 }
  0x93   : > { %v292_v31 = vsel %vm290_vm1, %v1035_v27, %v1036_v26  ;;  %v293_v32 = vsel %vm290_vm1, %v1036_v26, %v1040_v28  ;;  %v450_v34 = vsel %vm442_vm2, %v1030_v22, %v1040_v28  ;;  %v291_v22 = vsel %vm290_vm1, %v1041_v2, %v1035_v27 }
  0x94   : > { %v1044_v35 = vpop.permute.xlu0 %1043  ;;  %v1049_v36 = vpop.permute.xlu1 %1048  ;;  %v1122_v37 = vpack.i.bf16 %v450_v34, %v446_v33  ;;  %v448_v38 = vsel %vm442_vm2, %v276_v29, %v292_v31  ;;  %v449_v39 = vsel %vm442_vm2, %v277_v30, %v293_v32  ;;  %v259_v29 = vsel %vm258_vm5, %v1021_v63, %v1015_v58 }
  0x95   : > { %v1137_v40 = vpack.i.bf16 %v449_v39, %v448_v38  ;;  %v1046_v41 = vunpack.i.h.bf16 %v1044_v35  ;;  %v1045_v42 = vunpack.i.l.bf16 %v1044_v35  ;;  %v1050_v43 = vunpack.i.l.bf16 %v1049_v36 }
  0x96   : > { %1123 = vrot.lane.b32.xlu0 %v1122_v37, %s1210_s11  ;;  %v1051_v4 = vunpack.i.h.bf16 %v1049_v36  ;;  %v444_v31 = vsel %vm442_vm2, %v1265_v3, %v260_v11  ;;  %v275_v27 = vsel %vm274_vm0, %v1031_v13, %v1025_v21  ;;  %vm826_vm0 = vcmask 15360  }
  0x97   : > { %1138 = vrot.lane.b32.xlu1 %v1137_v40, %s1210_s11  ;;  %v308_v49 = vsel %vm306_vm3, %v1045_v42, %v1046_v41  ;;  %v309_v50 = vsel %vm306_vm3, %v1046_v41, %v1050_v43  ;;  %v447_v3 = vsel %vm442_vm2, %v275_v27, %v291_v22  ;;  %v1132_v21 = vpack.i.bf16 %v445_v24, %v444_v31  ;;  %v1410_v31 = vld [vmem:[%s1493_s1] sm:$0xff] }
  0x98   : > { %v1054_v44 = vpop.permute.xlu0 %1053  ;;  %v1059_v45 = vpop.permute.xlu1 %1058  ;;  %v307_v25 = vsel %vm306_vm3, %v1051_v4, %v1045_v42  ;;  %v443_v41 = vsel %vm442_vm2, %v1257_v0, %v259_v29  ;;  %960 = vmatprep.mubr.msk.f32.mxu1 %vm601_vm13, %v1410_v31  ;;  %vm828_vm1 = vcmask 11264  }
  0x99   : > { %v1056_v46 = vunpack.i.h.bf16 %v1054_v44  ;;  %v1055_v47 = vunpack.i.l.bf16 %v1054_v44  ;;  %v1060_v48 = vunpack.i.l.bf16 %v1059_v45  ;;  %v1061_v59 = vunpack.i.h.bf16 %v1059_v45 }
  0x9a   : > { %v1142_v45 = vpack.i.bf16 %v447_v3, %v443_v41 }
  0x9b   : > { %v324_v51 = vsel %vm322_vm4, %v1055_v47, %v1056_v46  ;;  %v325_v52 = vsel %vm322_vm4, %v1056_v46, %v1060_v48  ;;  %v323_v14 = vsel %vm322_vm4, %v1061_v59, %v1055_v47  ;;  %v454_v18 = vsel %vm442_vm2, %v1050_v43, %v1060_v48 }
  0x9c   : > { %v1321_v53 = vpop.permute.xlu0 %1063  ;;  %v1323_v54 = vpop.permute.xlu1 %1068  ;;  %v452_v55 = vsel %vm442_vm2, %v308_v49, %v324_v51  ;;  %v453_v56 = vsel %vm442_vm2, %v309_v50, %v325_v52  ;;  %v451_v30 = vsel %vm442_vm2, %v307_v25, %v323_v14 }
  0x9d   : > { %v1147_v60 = vpack.i.bf16 %v453_v56, %v452_v55  ;;  %v1065_v61 = vunpack.i.l.bf16 %v1321_v53  ;;  %v1071_v62 = vunpack.i.h.bf16 %v1323_v54  ;;  %v1070_v7 = vunpack.i.l.bf16 %v1323_v54 }
  0x9e   : > { %v1066_v32 = vunpack.i.h.bf16 %v1321_v53 }
  0x9f   : > { %1148 = vrot.lane.b32.xlu1 %v1147_v60, %s1210_s11  ;;  %v343_v15 = vsel %vm342_vm6, %v1071_v62, %v1065_v61 }
  0xa0   : > { %v1074_v5 = vpop.permute.xlu0 %1073  ;;  %v1079_v6 = vpop.permute.xlu1 %1078  ;;  %v344_v42 = vsel %vm342_vm6, %v1065_v61, %v1066_v32  ;;  %v345_v49 = vsel %vm342_vm6, %v1066_v32, %v1070_v7 }
  0xa1   : > { %v1075_v8 = vunpack.i.l.bf16 %v1074_v5  ;;  %v1081_v9 = vunpack.i.h.bf16 %v1079_v6  ;;  %v1080_v10 = vunpack.i.l.bf16 %v1079_v6  ;;  %v1076_v33 = vunpack.i.h.bf16 %v1074_v5 }
  0xa3   : > { %v359_v16 = vsel %vm358_vm7, %v1081_v9, %v1075_v8  ;;  %v458_v20 = vsel %vm442_vm2, %v1070_v7, %v1080_v10  ;;  %v360_v43 = vsel %vm358_vm7, %v1075_v8, %v1076_v33  ;;  %v361_v44 = vsel %vm358_vm7, %v1076_v33, %v1080_v10 }
  0xa4   : > { %v1347_v26 = vpop.permute.xlu0 %1083  ;;  %v1349_v23 = vpop.permute.xlu1 %1088  ;;  %v1127_v19 = vpack.i.bf16 %v458_v20, %v454_v18  ;;  %v455_v28 = vsel %vm442_vm2, %v343_v15, %v359_v16  ;;  %v456_v56 = vsel %vm442_vm2, %v344_v42, %v360_v43  ;;  %v457_v57 = vsel %vm442_vm2, %v345_v49, %v361_v44 }
  0xa5   : > { %v1157_v34 = vpack.i.bf16 %v455_v28, %v451_v30  ;;  %v1086_v35 = vunpack.i.h.bf16 %v1347_v26  ;;  %v1085_v36 = vunpack.i.l.bf16 %v1347_v26  ;;  %v1090_v37 = vunpack.i.l.bf16 %v1349_v23 }
  0xa6   : > { %1128 = vrot.lane.b32.xlu0 %v1127_v19, %s1210_s11  ;;  %v1091_v55 = vunpack.i.h.bf16 %v1349_v23  ;;  %v1152_v5 = vpack.i.bf16 %v457_v57, %v456_v56  ;;  %v1211_v30 = vmov 0.0   ;;  %v469_v23 = vld [vmem:[%s1494_s2] sm:$0xff] }
  0xa7   : > { %1158 = vrot.lane.b32.xlu1 %v1157_v34, %s1210_s11  ;;  %v376_v46 = vsel %vm374_vm8, %v1085_v36, %v1086_v35  ;;  %v377_v47 = vsel %vm374_vm8, %v1086_v35, %v1090_v37  ;;  %678 = vmatprep.mubr.f32.mxu0 %v1211_v30 }
  0xa8   : > { %v1094_v1 = vpop.permute.xlu0 %1093  ;;  %v1368_v17 = vpop.permute.xlu1 %1098  ;;  %v375_v10 = vsel %vm374_vm8, %v1091_v55, %v1085_v36 }
  0xa9   : > { %v1096_v38 = vunpack.i.h.bf16 %v1094_v1  ;;  %v1095_v39 = vunpack.i.l.bf16 %v1094_v1  ;;  %v1100_v40 = vunpack.i.l.bf16 %v1368_v17  ;;  %v1101_v50 = vunpack.i.h.bf16 %v1368_v17 }
  0xaa   : > { %1133 = vrot.lane.b32.xlu0 %v1132_v21, %s1210_s11  ;;  %v1212_v1 = vmov 0   ;;  %v470_v21 = vld [vmem:[%s1494_s2 + $0x8] sm:$0xf] }
  0xab   : > { %v392_v48 = vsel %vm390_vm9, %v1095_v39, %v1096_v38  ;;  %v393_v0 = vsel %vm390_vm9, %v1096_v38, %v1100_v40  ;;  %v391_v63 = vsel %vm390_vm9, %v1101_v50, %v1095_v39  ;;  %v462_v35 = vsel %vm442_vm2, %v1090_v37, %v1100_v40  ;;  %1183 = vset.pattern.permute.xlu1 %v1212_v1 }
  0xac   : > { %v1104_v51 = vpop.permute.xlu0 %1103  ;;  %v1109_v52 = vpop.permute.xlu1 %1108  ;;  %v460_v53 = vsel %vm442_vm2, %v376_v46, %v392_v48  ;;  %v461_v54 = vsel %vm442_vm2, %v377_v47, %v393_v0  ;;  %v459_v20 = vsel %vm442_vm2, %v375_v10, %v391_v63  ;;  %1182 = vset.pattern.permute.xlu0 %v1212_v1 }
  0xad   : > { %v1106_v58 = vunpack.i.h.bf16 %v1104_v51  ;;  %v1105_v59 = vunpack.i.l.bf16 %v1104_v51  ;;  %v1111_v60 = vunpack.i.h.bf16 %v1109_v52  ;;  %v1162_v61 = vpack.i.bf16 %v461_v54, %v460_v53 }
  0xae   : > { %1143 = vrot.lane.b32.xlu0 %v1142_v45, %s1210_s11  ;;  %v1110_v62 = vunpack.i.l.bf16 %v1109_v52 }
  0xaf   : > { %1163 = vrot.lane.b32.xlu1 %v1162_v61, %s1210_s11  ;;  %v408_v11 = vsel %vm406_vm10, %v1105_v59, %v1106_v58  ;;  %v407_v12 = vsel %vm406_vm10, %v1111_v60, %v1105_v59 }
  0xb0   : > { %v1114_v2 = vpop.permute.xlu0 %1113  ;;  %v1119_v4 = vpop.permute.xlu1 %1118  ;;  %v409_v13 = vsel %vm406_vm10, %v1106_v58, %v1110_v62 }
  0xb1   : > { %v1116_v6 = vunpack.i.h.bf16 %v1114_v2  ;;  %v1115_v7 = vunpack.i.l.bf16 %v1114_v2  ;;  %v1121_v8 = vunpack.i.h.bf16 %v1119_v4  ;;  %v1120_v9 = vunpack.i.l.bf16 %v1119_v4 }
  0xb2   : > { %1153 = vrot.lane.b32.xlu0 %v1152_v5, %s1210_s11 }
  0xb3   : > { %v424_v14 = vsel %vm422_vm11, %v1115_v7, %v1116_v6  ;;  %v423_v15 = vsel %vm422_vm11, %v1121_v8, %v1115_v7  ;;  %v425_v16 = vsel %vm422_vm11, %v1116_v6, %v1120_v9  ;;  %v466_v33 = vsel %vm442_vm2, %v1110_v62, %v1120_v9 }
  0xb4   : > { %v433_v18 = vpop.permute.xlu0 %432  ;;  %v463_v22 = vsel %vm442_vm2, %v407_v12, %v423_v15  ;;  %v464_v25 = vsel %vm442_vm2, %v408_v11, %v424_v14  ;;  %v465_v26 = vsel %vm442_vm2, %v409_v13, %v425_v16  ;;  %v435_v19 = vpop.permute.xlu1 %434  ;;  %v1177_v36 = vpack.i.bf16 %v466_v33, %v462_v35 }
  0xb5   : > { %v1172_v28 = vpack.i.bf16 %v463_v22, %v459_v20  ;;  %v1167_v29 = vpack.i.bf16 %v465_v26, %v464_v25  ;;  %v440_v32 = vsel %vm438_vm12, %v433_v18, %v435_v19 }
  0xb7   : > { %1173 = vrot.lane.b32.xlu1 %v1172_v28, %s1210_s11  ;;  %1168 = vrot.lane.b32.xlu0 %v1167_v29, %s1210_s11 }
  0xb8   : > { %v437_v24 = vpop.permute.xlu0 %436  ;;  %v431_v34 = vpop.permute.xlu1 %430 }
  0xb9   : > { %v441_v27 = vsel %vm438_vm12, %v435_v19, %v437_v24  ;;  %v439_v3 = vsel %vm438_vm12, %v431_v34, %v433_v18 }
  0xbb   : > { %555 = vrot.lane.b32.xlu1 %v440_v32, %s1210_s11  ;;  %557 = vrot.lane.b32.xlu0 %v441_v27, %s1210_s11 }
  0xbf   : > { %1178 = vrot.lane.b32.xlu1 %v1177_v36, %s1210_s11  ;;  %553 = vrot.lane.b32.xlu0 %v439_v3, %s1210_s11 }
  0xc3   : > { %559 = vrot.lane.b32.xlu1 %v437_v24, %s1210_s11  ;;  %478 = vperm.xlu0 %1182, %v470_v21  }
  0xc7   : > { %473 = vperm.xlu1 %1183, %v469_v23  }
 0x108   : > { %v1124_v37 = vpop.permute.xlu0 %1123 }
 0x109   : > { %v1139_v17 = vpop.permute.xlu1 %1138  ;;  %v1126_v39 = vunpack.i.h.bf16 %v1124_v37  ;;  %v1125_v44 = vunpack.i.l.bf16 %v1124_v37 }
 0x10a   : > { %v1141_v40 = vunpack.i.h.bf16 %v1139_v17  ;;  %v1140_v41 = vunpack.i.l.bf16 %v1139_v17 }
 0x10c   : > { %v566_v0 = vsel %vm561_vm14, %v1140_v41, %v1141_v40  ;;  %v567_v50 = vsel %vm561_vm14, %v1141_v40, %v1126_v39 }
 0x111   : > { %v1149_v42 = vpop.permute.xlu1 %1148 }
 0x112   : > { %v1151_v56 = vunpack.i.h.bf16 %v1149_v42  ;;  %v1150_v57 = vunpack.i.l.bf16 %v1149_v42 }
 0x114   : > { %v569_v8 = vsel %vm561_vm14, %v1150_v57, %v1151_v56 }
 0x118   : > { %v1129_v38 = vpop.permute.xlu0 %1128 }
 0x119   : > { %v1159_v47 = vpop.permute.xlu1 %1158  ;;  %v1130_v58 = vunpack.i.l.bf16 %v1129_v38  ;;  %v1131_v4 = vunpack.i.h.bf16 %v1129_v38 }
 0x11a   : > { %v1160_v59 = vunpack.i.l.bf16 %v1159_v47  ;;  %v1161_v5 = vunpack.i.h.bf16 %v1159_v47 }
 0x11b   : > { %v570_v9 = vsel %vm561_vm14, %v1151_v56, %v1130_v58 }
 0x11c   : > { %v1134_v43 = vpop.permute.xlu0 %1133  ;;  %v568_v10 = vsel %vm561_vm14, %v1160_v59, %v1150_v57 }
 0x11d   : > { %v1136_v45 = vunpack.i.h.bf16 %v1134_v43  ;;  %v1135_v46 = vunpack.i.l.bf16 %v1134_v43  ;;  %v468_v43 = vld [vmem:[%s1493_s1 + $0x8] sm:$0xf] }
 0x11f   : > { %v563_v48 = vsel %vm561_vm14, %v1135_v46, %v1136_v45  ;;  %v564_v49 = vsel %vm561_vm14, %v1136_v45, %v1125_v44 }
 0x120   : > { %v1144_v51 = vpop.permute.xlu0 %1143  ;;  %v963_v52 = vpack.c.bf16 %v566_v0, %v563_v48  ;;  %v975_v53 = vpack.c.bf16 %v567_v50, %v564_v49 }
 0x121   : > { %v1146_v54 = vunpack.i.h.bf16 %v1144_v51  ;;  %v1145_v55 = vunpack.i.l.bf16 %v1144_v51  ;;  %v1164_v62 = vpop.permute.xlu1 %1163 }
 0x122   : > { %964 = vmatprep.subr.bf16.mxu0 %v963_v52  ;;  %976 = vmatprep.subr.bf16.mxu1 %v975_v53  ;;  %v1166_v11 = vunpack.i.h.bf16 %v1164_v62  ;;  %v1165_v15 = vunpack.i.l.bf16 %v1164_v62 }
 0x123   : > { %978 = vmatpush3.bf16.msra.mxu1 %v975_v53  ;;  %v562_v60 = vsel %vm561_vm14, %v1145_v55, %v1135_v46  ;;  %v565_v61 = vsel %vm561_vm14, %v1146_v54, %v1140_v41 }
 0x124   : > { %v1154_v63 = vpop.permute.xlu0 %1153  ;;  %v965_v2 = vpack.c.bf16 %v565_v61, %v562_v60  ;;  %v575_v24 = vsel %vm561_vm14, %v1165_v15, %v1166_v11 }
 0x125   : > { %v1156_v6 = vunpack.i.h.bf16 %v1154_v63  ;;  %v1155_v7 = vunpack.i.l.bf16 %v1154_v63 }
 0x126   : > { %966 = vmatpush1.bf16.msra.mxu0 %v965_v2 }
 0x127   : > { %v572_v12 = vsel %vm561_vm14, %v1155_v7, %v1156_v6  ;;  %v573_v13 = vsel %vm561_vm14, %v1156_v6, %v1131_v4  ;;  %v571_v14 = vsel %vm561_vm14, %v1161_v5, %v1155_v7 }
 0x128   : > { %v967_v16 = vpack.c.bf16 %v572_v12, %v569_v8  ;;  %v979_v18 = vpack.c.bf16 %v573_v13, %v570_v9  ;;  %v969_v20 = vpack.c.bf16 %v571_v14, %v568_v10 }
 0x129   : > { %v1174_v22 = vpop.permute.xlu1 %1173  ;;  %v1169_v25 = vpop.permute.xlu0 %1168 }
 0x12a   : > { %v1176_v26 = vunpack.i.h.bf16 %v1174_v22  ;;  %v1175_v19 = vunpack.i.l.bf16 %v1174_v22  ;;  %v1171_v28 = vunpack.i.h.bf16 %v1169_v25  ;;  %v1170_v29 = vunpack.i.l.bf16 %v1169_v25  ;;  %968 = vmatprep.subr.bf16.mxu0 %v967_v16  ;;  %980 = vmatprep.subr.bf16.mxu1 %v979_v18 }
 0x12b   : > { %970 = vmatpush1.bf16.msra.mxu0 %v969_v20  ;;  %982 = vmatpush3.bf16.msra.mxu1 %v979_v18 }
 0x12c   : > { %v578_v27 = vsel %vm561_vm14, %v1170_v29, %v1171_v28  ;;  %v574_v32 = vsel %vm561_vm14, %v1175_v19, %v1165_v15  ;;  %v577_v33 = vsel %vm561_vm14, %v1176_v26, %v1170_v29 }
 0x12d   : > { %v556_v34 = vpop.permute.xlu1 %555  ;;  %v558_v35 = vpop.permute.xlu0 %557  ;;  %v971_v36 = vpack.c.bf16 %v578_v27, %v575_v24  ;;  %v973_v3 = vpack.c.bf16 %v577_v33, %v574_v32 }
 0x12e   : > { %v581_v1 = vsel %vm561_vm14, %v556_v34, %v558_v35 }
 0x12f   : > { %972 = vmatprep.subr.bf16.mxu0 %v971_v36 }
 0x130   : > { %974 = vmatpush1.bf16.msra.mxu0 %v973_v3 }
 0x131   : > { %v1179_v21 = vpop.permute.xlu1 %1178  ;;  %v554_v23 = vpop.permute.xlu0 %553  ;;  %927 = vmatprep.subr.msk.mxu0 %vm442_vm2, %v581_v1 }
 0x132   : > { %v1181_v37 = vunpack.i.h.bf16 %v1179_v21  ;;  %v1180_v17 = vunpack.i.l.bf16 %v1179_v21  ;;  %v580_v38 = vsel %vm561_vm14, %v554_v23, %v556_v34 }
 0x134   : > { %928 = vmatpush1.msk.msra.mxu0 %vm442_vm2, %v580_v38  ;;  %v576_v39 = vsel %vm561_vm14, %v1166_v11, %v1180_v17  ;;  %v579_v40 = vsel %vm561_vm14, %v1171_v28, %v1181_v37 }
 0x135   : > { %v560_v41 = vpop.permute.xlu1 %559  ;;  %929 = vmatmul.mubr.msk.f32.vlgmr.msra.gmra.mrb[0].mxu0 %vm601_vm13, %v1410_v31  ;;  %v983_v42 = vpack.c.bf16 %v579_v40, %v576_v39  ;;  %v768_v31 = vlaneseq }
 0x136   : > { %684 = vmatprep.mubr.f32.mxu0 %v1211_v30  ;;  %v582_v44 = vsel %vm561_vm14, %v558_v35, %v560_v41  ;;  %v766_v30 = vld [vmem:[%s1495_s3] sm:$0x7] }
 0x137   : > { %984 = vmatprep.subr.bf16.mxu1 %v983_v42  ;;  %v769_v45 = vshrl.u32 %v768_v31, 7 }
 0x138   : > { %986 = vmatpush3.bf16.msra.mxu1 %v983_v42 }
 0x139   : > { %930 = vmatmul.mubr.msk.f32.gmra.mrb[2].mxu0 %vm601_vm13, %v468_v43  ;;  %958 = vmatprep.subr.msk.mxu1 %vm442_vm2, %v582_v44  ;;  %v770_v46 = vsub.s32 0, %v769_v45  ;;  %v774_v47 = vsub.s32 1, %v769_v45  ;;  %v778_v56 = vsub.s32 2, %v769_v45 }
 0x13b   : > { %v771_v0 = vrot.slane %v766_v30, %v770_v46  ;;  %v775_v50 = vrot.slane %v766_v30, %v774_v47  ;;  %v779_v5 = vrot.slane %v766_v30, %v778_v56 }
 0x13c   : > { %959 = vmatpush3.msk.msra.mxu1 %vm442_vm2, %v582_v44 }
 0x13d   : > { %961 = vmatmul.mubr.msk.f32.vlgmr.msra.gmra.mrb[0].mxu1 %vm601_vm13, %v468_v43 }
 0x142   : > { %v479_v54 = vpop.permute.xlu0 %478 }
 0x146   : > { %v474_v48 = vpop.permute.xlu1 %473 }
 0x208   : > { %v680_v49 = vpop.f32.mrb[0].mxu0 }
 0x209   : > { %v681_v51 = vadd.f32 %v680_v49, %v474_v48  ;;  %v682_v52 = vpop.f32.mrb[1].mxu0 }
 0x20a   : > { %v683_v53 = vadd.f32 %v682_v52, %v474_v48 }
 0x20b   : > { %v783_v55 = vmul.f32 %v771_v0, %v681_v51 }
 0x20c   : > { %v784_v57 = vmul.f32 %v775_v50, %v683_v53  ;;  %v686_v58 = vpop.f32.mrb[2].mxu0 }
 0x20d   : > { %789 = vst [vmem:[%s1471_s27] sm:$0xff] %v783_v55  ;;  %v687_v59 = vadd.f32 %v686_v58, %v479_v54  ;;  %v688_v60 = vpop.f32.mrb[3].mxu0  ;;  %v806_v61 = vmul.f32 %v783_v55, %v783_v55 }
 0x20e   : > { %790 = vst [vmem:[%s1471_s27 + $0x8] sm:$0xff] %v784_v57  ;;  %v689_v62 = vadd.f32 %v688_v60, %v479_v54  ;;  %v795_v63 = vadd.f32 %v784_v57, %v783_v55  ;;  %v807_v2 = vmul.f32 %v784_v57, %v784_v57 }
 0x20f   : > { %v786_v4 = vmul.f32 %v771_v0, %v687_v59 }
 0x210   : > { %v787_v6 = vmul.f32 %v775_v50, %v689_v62  ;;  %v962_v7 = vpop.f32.mrb[0].mxu1  ;;  %v812_v8 = vadd.f32 %v807_v2, %v806_v61 }
 0x211   : > { %792 = vst [vmem:[%s1471_s27 + $0x18] sm:$0xf] %v786_v4  ;;  %v763_v9 = vadd.f32 %v962_v7, %v479_v54  ;;  %v757_v10 = vpop.f32.mrb[1].mxu1  ;;  %v799_v11 = vsel %vm442_vm2, %v786_v4, 0.0  ;;  %v809_v12 = vmul.f32 %v786_v4, %v786_v4 }
 0x212   : > { %793 = vst [vmem:[%s1471_s27 + $0x20] sm:$0xf] %v787_v6  ;;  %v758_v13 = vadd.f32 %v757_v10, %v474_v48  ;;  %v800_v14 = vsel %vm442_vm2, %v787_v6, 0.0  ;;  %v810_v15 = vmul.f32 %v787_v6, %v787_v6 }
 0x213   : > { %v788_v16 = vmul.f32 %v779_v5, %v763_v9  ;;  %v801_v18 = vadd.f32 %v800_v14, %v799_v11  ;;  %v816_v20 = vsel %vm442_vm2, %v809_v12, 0.0 }
 0x214   : > { %v785_v22 = vmul.f32 %v779_v5, %v758_v13  ;;  %v817_v25 = vsel %vm442_vm2, %v810_v15, 0.0 }
 0x215   : > { %794 = vst [vmem:[%s1471_s27 + $0x28] sm:$0xf] %v788_v16  ;;  %v802_v26 = vsel %vm442_vm2, %v788_v16, 0.0  ;;  %v811_v19 = vmul.f32 %v788_v16, %v788_v16  ;;  %v818_v28 = vadd.f32 %v817_v25, %v816_v20 }
 0x216   : > { %791 = vst [vmem:[%s1471_s27 + $0x10] sm:$0xff] %v785_v22  ;;  %v803_v29 = vadd.f32 %v802_v26, %v801_v18  ;;  %v796_v24 = vadd.f32 %v795_v63, %v785_v22  ;;  %v808_v27 = vmul.f32 %v785_v22, %v785_v22 }
 0x217   : > { %v819_v32 = vsel %vm442_vm2, %v811_v19, 0.0 }
 0x218   : > { %804 = vadd.xlane.f32.xlu0 %v803_v29  ;;  %797 = vadd.xlane.f32.xlu1 %v796_v24  ;;  %v813_v33 = vadd.f32 %v812_v8, %v808_v27  ;;  %v820_v34 = vadd.f32 %v819_v32, %v818_v28 }
 0x21c   : > { %814 = vadd.xlane.f32.xlu0 %v813_v33  ;;  %821 = vadd.xlane.f32.xlu1 %v820_v34 }
 0x2a5   : > { %v805_v35 = vpop.xlane.xlu0 %804  ;;  %v798_v36 = vpop.xlane.xlu1 %797 }
 0x2a9   : > { %v815_v3 = vpop.xlane.xlu0 %814  ;;  %v822_v1 = vpop.xlane.xlu1 %821 }
 0x2aa   : > { %v824_v21 = vsel %vm823_vm15, %v798_v36, %v815_v3  ;;  %v825_v23 = vsel %vm823_vm15, %v805_v35, %v822_v1 }
 0x2ab   : > { %827 = vst.msk [vmem:[%s237_s6] sm:$0xff] %vm826_vm0, %v824_v21 }
 0x2ac   : > { %829 = vst.msk [vmem:[%s237_s6 + $0x8] sm:$0xf] %vm828_vm1, %v825_v23 }
 0x2ad PF: > { %s16_s18 = sadd.s32 1, %s1196_s18  }
 0x2ae   : > { %p13_p4 = scmp.ge.s32.totalorder %s16_s18, 4  }
 0x2b0   :  { %15 = sbr.rel (!%p13_p4) target bundleno = 1 (0x1), region = 78 }

</bundles_post_ra>
